<compile_context>
chip_gen: v7x
topology: tpu7x:2x2x1
jax: 0.10.0
libtpu: 0.0.40
codegen_flags: <defaults>
</compile_context>

<pallas_src>
import jax
import jax.numpy as jnp
from jax.experimental import pallas as pl
from jax.experimental.pallas import tpu as pltpu


def _make_kernel(has_mask: bool, write_att: bool, exact_softmax: bool,
                 compute_dtype):
    def kernel(*refs):
        it = iter(refs)
        x_ref = next(it)                               # (1, C, TQ)  f32
        k_ref = next(it)                               # (1, S, E)   bf16
        vt_ref = next(it)                              # (1, E, S)   bf16
        mb_ref = next(it) if has_mask else None        # (1, S, TQ)  bf16 bias
        wxq_ref = next(it)                             # (E, C)      bf16
        bxq_ref = next(it)                             # (E, 1)      f32
        wo_ref = next(it)                              # (C, E)      bf16
        bo_ref = next(it)                              # (C, 1)      f32
        out_ref = next(it)                             # (1, C, TQ)  f32
        att_ref = next(it) if write_att else None      # (1, S, TQ)  bf16

        # q^T = Wxq^T @ x^T + bxq  (proj_in, Wq and softmax scale pre-folded;
        # channels-major tokens so the query axis stays in the lanes).
        x_t = x_ref[0].astype(compute_dtype)                              # (C, TQ)
        q_t = (jnp.dot(wxq_ref[...], x_t, preferred_element_type=jnp.float32)
               + bxq_ref[...]).astype(compute_dtype)                      # (E, TQ)

        # scores^T = K @ q^T  (context axis in sublanes, queries in lanes).
        s_t = jnp.dot(k_ref[0], q_t, preferred_element_type=jnp.float32)  # (S, TQ)
        if has_mask:
            s_t = s_t + mb_ref[0]          # additive {0, -1e9} bias (bf16 -> f32)

        # softmax over the context axis (axis 0 of the (S, TQ) tile).
        s_t = s_t - jnp.max(s_t, axis=0, keepdims=True)
        p = jnp.exp(s_t)
        denom = jnp.sum(p, axis=0, keepdims=True)
        if exact_softmax:
            p = p / denom
        else:
            p = p * pl.reciprocal(denom, approx=True)
        p_c = p.astype(compute_dtype)
        if write_att:
            att_ref[0] = p_c                                               # bf16

        # out^T = Wout^T @ (V^T @ att^T) + b_out
        o_t = jnp.dot(vt_ref[0], p_c, preferred_element_type=jnp.float32)  # (E, TQ)
        out_ref[0] = (jnp.dot(wo_ref[...], o_t.astype(compute_dtype),
                              preferred_element_type=jnp.float32)
                      + bo_ref[...])                                        # (C, TQ)

    return kernel


def _pick_q_tile(hw: int, cap: int) -> int:
    """Largest multiple-of-128 divisor of hw that is <= cap."""
    if hw % 128 != 0:
        # TODO(synk): pad hw up to a multiple of 128 instead of a single
        # (possibly lane-unaligned, unpipelined) full-extent block.
        return hw
    cap = min(max(cap - cap % 128, 128), hw)
    for cand in range(cap, 127, -128):
        if hw % cand == 0:
            return cand
    return 128


def cross_attention_pallas(x_nchw, context, params, pad_mask=None, *,
                           q_tile=None, q_tile_cap=512,
                           matmul_dtype=jnp.bfloat16,
                           return_att=True, exact_softmax=False):
    """x_nchw: [b, c, h, w] f32; context: [b, s, e] f32;
       pad_mask: optional [b, h*w, s] (nonzero/True => masked).
       Returns (out [b, c, h, w] f32, att [b, h*w, s] f32  or None).

       Note: masking is applied as an additive -1e9 bias rather than a
       masked_fill, so a query row whose keys are ALL masked returns the
       softmax of its raw scores instead of PyTorch's uniform distribution;
       rows with at least one visible key match to ~bf16 precision."""
    b, c, h, w = x_nchw.shape
    _, s, e = context.shape
    hw = h * w
    scale = float(e) ** (-0.5)
    has_mask = pad_mask is not None

    if q_tile is None or q_tile <= 0 or hw % q_tile != 0:
        # 512 ~ HBM-roofline sweet spot on v6e; pass q_tile_cap=256 on a very
        # VMEM-tight v7x config.
        q_tile = _pick_q_tile(hw, q_tile_cap)
    n_qt = hw // q_tile

    (w_in, b_in, wq, bq, wk, bk, wv, bv, w_out, b_out) = params

    # proj_in and the softmax scale folded into the query projection; weights
    # pre-transposed so every kernel contraction is a plain jnp.dot.
    wxq_t = ((w_in @ wq) * scale).T.astype(matmul_dtype)                   # (E, C)
    bxq_col = ((b_in @ wq + bq) * scale).astype(jnp.float32).T             # (E, 1)
    wo_t = w_out.T.astype(matmul_dtype)                                    # (C, E)
    bo_col = b_out.astype(jnp.float32).T                                   # (C, 1)

    # K / V^T hoisted out of the kernel (tiny matmuls, once per call) so every
    # grid step is independent -> both grid axes "parallel" (v7x dual core).
    k = (context @ wk + bk).astype(matmul_dtype)                           # (b, S, E)
    v_t = jnp.transpose(context @ wv + bv, (0, 2, 1)).astype(matmul_dtype)  # (b, E, S)

    # NCHW reshaped to (b, C, HW) is already the native memory layout; x stays
    # f32 in HBM (no wrapper cast pass) and is cast to bf16 inside the kernel.
    x_ct = x_nchw.reshape(b, c, hw)

    in_specs = [
        pl.BlockSpec((1, c, q_tile), lambda i, t: (i, 0, t)),   # x   (f32)
        pl.BlockSpec((1, s, e), lambda i, t: (i, 0, 0)),        # K   (per batch)
        pl.BlockSpec((1, e, s), lambda i, t: (i, 0, 0)),        # V^T (per batch)
    ]
    operands = [x_ct, k, v_t]
    if has_mask:
        mask_t = jnp.transpose(jnp.asarray(pad_mask).astype(bool), (0, 2, 1))
        mask_bias = jnp.where(mask_t, -1e9, 0.0).astype(matmul_dtype)      # (b, S, HW)
        in_specs.append(pl.BlockSpec((1, s, q_tile), lambda i, t: (i, 0, t)))
        operands.append(mask_bias)

    weights = [wxq_t, bxq_col, wo_t, bo_col]           # grid-constant operands
    in_specs += [pl.BlockSpec(wgt.shape, lambda i, t: (0, 0)) for wgt in weights]
    operands += weights

    out_specs = [pl.BlockSpec((1, c, q_tile), lambda i, t: (i, 0, t))]   # out^T f32
    out_shape = [jax.ShapeDtypeStruct((b, c, hw), jnp.float32)]
    if return_att:
        # att^T written lane-dense and in bf16 (halves writeback + transpose).
        out_specs.append(pl.BlockSpec((1, s, q_tile), lambda i, t: (i, 0, t)))
        out_shape.append(jax.ShapeDtypeStruct((b, s, hw), matmul_dtype))

    # Explicit VMEM budget from the actual resident buffers, with headroom.
    itm = jnp.finfo(matmul_dtype).bits // 8
    blk_bytes = (c * q_tile * 4                      # x block (f32)
                 + (s * e + e * s) * itm             # K, V^T per-batch blocks
                 + (s * q_tile * itm if has_mask else 0)
                 + c * q_tile * 4                    # out block (f32)
                 + (s * q_tile * itm if return_att else 0))
    const_bytes = (e * c + c * e) * itm + (e + c) * 4
    vmem_limit = int(min(128 << 20,
                         max(32 << 20, 2 * (2 * blk_bytes + const_bytes) + (4 << 20))))

    flops = int(b * hw * (4 * c * e + 4 * s * e))    # q proj, QK^T, PV, out proj
    bytes_accessed = int(sum(int(a.size) * a.dtype.itemsize for a in operands)
                         + b * c * hw * 4
                         + (b * s * hw * itm if return_att else 0))
    cost = pl.CostEstimate(flops=flops, transcendentals=int(b * hw * s),
                           bytes_accessed=bytes_accessed)

    results = pl.pallas_call(
        _make_kernel(has_mask, return_att, exact_softmax, matmul_dtype),
        out_shape=out_shape,
        grid_spec=pltpu.PrefetchScalarGridSpec(
            num_scalar_prefetch=0,
            grid=(b, n_qt),
            in_specs=in_specs,
            out_specs=out_specs),
        compiler_params=pltpu.CompilerParams(
            dimension_semantics=("parallel", "parallel"),
            vmem_limit_bytes=vmem_limit),
        cost_estimate=cost,
    )(*operands)

    out = results[0].reshape(b, c, h, w)              # (b, C, HW) is already NCHW
    if not return_att:
        return out, None
    # bf16 read + f32 write, fused transpose+convert (one HBM pass).
    att = jnp.transpose(results[1], (0, 2, 1)).astype(jnp.float32)   # (b, HW, S)
    return out, att


def init_params(key, in_channels, emb_dim):
    """Deterministic parameter init. Weights stored pre-transposed so that
    y = x @ W + b (PyTorch Linear is y = x @ W.T + b)."""
    ks = jax.random.split(key, 10)
    c, e = in_channels, emb_dim
    sc = 0.05
    w_in = sc * jax.random.normal(ks[0], (c, e), jnp.float32)    # conv1x1 [e,c,1,1] -> (c,e)
    b_in = sc * jax.random.normal(ks[1], (1, e), jnp.float32)
    wq = sc * jax.random.normal(ks[2], (e, e), jnp.float32)
    bq = sc * jax.random.normal(ks[3], (1, e), jnp.float32)
    wk = sc * jax.random.normal(ks[4], (e, e), jnp.float32)
    bk = sc * jax.random.normal(ks[5], (1, e), jnp.float32)
    wv = sc * jax.random.normal(ks[6], (e, e), jnp.float32)
    bv = sc * jax.random.normal(ks[7], (1, e), jnp.float32)
    w_out = sc * jax.random.normal(ks[8], (e, c), jnp.float32)   # conv1x1 [c,e,1,1] -> (e,c)
    b_out = sc * jax.random.normal(ks[9], (1, c), jnp.float32)
    return (w_in, b_in, wq, bq, wk, bk, wv, bv, w_out, b_out)


def _reference(x_nchw, context, params, pad_mask=None):
    """Pure-JAX (f32) reference of the PyTorch forward."""
    (w_in, b_in, wq, bq, wk, bk, wv, bv, w_out, b_out) = params
    b, c, h, w = x_nchw.shape
    e = context.shape[-1]
    xt = jnp.transpose(x_nchw, (0, 2, 3, 1)).reshape(b, h * w, c)
    xe = xt @ w_in + b_in
    q = xe @ wq + bq
    k = context @ wk + bk
    v = context @ wv + bv
    att = jnp.einsum('bid,bjd->bij', q, k) * (float(e) ** -0.5)
    if pad_mask is not None:
        att = jnp.where(pad_mask, -1e9, att)
    att = jax.nn.softmax(att, axis=-1)
    o = jnp.einsum('bij,bjd->bid', att, v)
    o = o @ w_out + b_out
    o = jnp.transpose(o.reshape(b, h, w, c), (0, 3, 1, 2))
    return o, att


if __name__ == "__main__":
    B, C, H, W = 2, 4, 16, 16     # x: [b, c, h, w]
    S, E = 8, 32                  # context: [b, seq, emb]

    key = jax.random.PRNGKey(0)
    kx, kc, kp, km = jax.random.split(key, 4)
    x = jax.random.normal(kx, (B, C, H, W), jnp.float32)
    context = jax.random.normal(kc, (B, S, E), jnp.float32)
    params = init_params(kp, C, E)

    # --- unmasked path; q_tile=128 exercises the query-tile grid axis.
    out, att = cross_attention_pallas(x, context, params, pad_mask=None, q_tile=128)
    jax.block_until_ready((out, att))
    ref_out, ref_att = _reference(x, context, params, None)
    assert out.shape == (B, C, H, W) and att.shape == (B, H * W, S)
    assert jnp.allclose(out, ref_out, atol=3e-2, rtol=3e-2)      # bf16 matmuls
    assert jnp.allclose(att, ref_att, atol=2e-2, rtol=2e-2)

    # --- attention-weights output skipped (no att writeback at all).
    out_na, att_na = cross_attention_pallas(x, context, params, return_att=False)
    jax.block_until_ready(out_na)
    assert att_na is None
    assert jnp.allclose(out_na, ref_out, atol=3e-2, rtol=3e-2)

    # --- masked path (keep at least one visible key per query so the additive
    #     -1e9 bias matches masked_fill semantics exactly; see docstring).
    pad_mask = jax.random.uniform(km, (B, H * W, S)) < 0.25
    pad_mask = pad_mask.at[:, :, 0].set(False)
    out_m, att_m = cross_attention_pallas(x, context, params, pad_mask=pad_mask)
    jax.block_until_ready((out_m, att_m))
    ref_out_m, ref_att_m = _reference(x, context, params, pad_mask)
    assert jnp.allclose(out_m, ref_out_m, atol=3e-2, rtol=3e-2)
    assert jnp.allclose(att_m, ref_att_m, atol=2e-2, rtol=2e-2)

    print("KERNEL_OK")
</pallas_src>

<mosaic_0001>
module attributes {stable_mosaic.version = 11 : i64} {
  func.func @kernel(%arg0: i32, %arg1: i32, %arg2: memref<1x4x128xf32, #tpu.memory_space<vmem>>, %arg3: memref<1x8x32xbf16, #tpu.memory_space<vmem>>, %arg4: memref<1x32x8xbf16, #tpu.memory_space<vmem>>, %arg5: memref<32x4xbf16, #tpu.memory_space<vmem>>, %arg6: memref<32x1xf32, #tpu.memory_space<vmem>>, %arg7: memref<4x32xbf16, #tpu.memory_space<vmem>>, %arg8: memref<4x1xf32, #tpu.memory_space<vmem>>, %arg9: memref<1x4x128xf32, #tpu.memory_space<vmem>>, %arg10: memref<1x8x128xbf16, #tpu.memory_space<vmem>>) attributes {dimension_semantics = [#tpu.dimension_semantics<parallel>, #tpu.dimension_semantics<parallel>], iteration_bounds = array<i64: 2, 2>, scalar_prefetch = 0 : i64, scratch_operands = 0 : i64, tpu.core_type = #tpu.core_type<tc>, window_params = [{transform_indices = @transform_0, window_bounds = array<i64: 1, 4, 128>}, {transform_indices = @transform_1, window_bounds = array<i64: 1, 8, 32>}, {transform_indices = @transform_2, window_bounds = array<i64: 1, 32, 8>}, {pipeline_mode = #tpu.pipeline_mode<synchronous>, transform_indices = @transform_3, window_bounds = array<i64: 32, 4>}, {pipeline_mode = #tpu.pipeline_mode<synchronous>, transform_indices = @transform_4, window_bounds = array<i64: 32, 1>}, {pipeline_mode = #tpu.pipeline_mode<synchronous>, transform_indices = @transform_5, window_bounds = array<i64: 4, 32>}, {pipeline_mode = #tpu.pipeline_mode<synchronous>, transform_indices = @transform_6, window_bounds = array<i64: 4, 1>}, {transform_indices = @transform_7, window_bounds = array<i64: 1, 4, 128>}, {transform_indices = @transform_8, window_bounds = array<i64: 1, 8, 128>}]} {
    %c0 = arith.constant 0 : index
    %c0_0 = arith.constant 0 : index
    %c0_1 = arith.constant 0 : index
    %0 = vector.load %arg2[%c0, %c0_0, %c0_1] : memref<1x4x128xf32, #tpu.memory_space<vmem>>, vector<1x4x128xf32>
    %1 = vector.shape_cast %0 : vector<1x4x128xf32> to vector<4x128xf32>
    %2 = arith.truncf %1 : vector<4x128xf32> to vector<4x128xbf16>
    %c0_2 = arith.constant 0 : index
    %c0_3 = arith.constant 0 : index
    %3 = vector.load %arg5[%c0_2, %c0_3] : memref<32x4xbf16, #tpu.memory_space<vmem>>, vector<32x4xbf16>
    %cst = arith.constant dense<0.000000e+00> : vector<32x128xf32>
    %4 = tpu.matmul %3, %2, %cst {dimension_numbers = #tpu.dot_dimension_numbers<[1], [0], [0], [1], [0, 0, 1, 1], [], []>} : vector<32x4xbf16>, vector<4x128xbf16>, vector<32x128xf32> -> vector<32x128xf32>
    %c0_4 = arith.constant 0 : index
    %c0_5 = arith.constant 0 : index
    %5 = vector.load %arg6[%c0_4, %c0_5] : memref<32x1xf32, #tpu.memory_space<vmem>>, vector<32x1xf32>
    %6 = vector.broadcast %5 : vector<32x1xf32> to vector<32x128xf32>
    %7 = arith.addf %4, %6 : vector<32x128xf32>
    %8 = arith.truncf %7 : vector<32x128xf32> to vector<32x128xbf16>
    %c0_6 = arith.constant 0 : index
    %c0_7 = arith.constant 0 : index
    %c0_8 = arith.constant 0 : index
    %9 = vector.load %arg3[%c0_6, %c0_7, %c0_8] : memref<1x8x32xbf16, #tpu.memory_space<vmem>>, vector<1x8x32xbf16>
    %10 = vector.shape_cast %9 : vector<1x8x32xbf16> to vector<8x32xbf16>
    %cst_9 = arith.constant dense<0.000000e+00> : vector<8x128xf32>
    %11 = tpu.matmul %10, %8, %cst_9 {dimension_numbers = #tpu.dot_dimension_numbers<[1], [0], [0], [1], [0, 0, 1, 1], [], []>} : vector<8x32xbf16>, vector<32x128xbf16>, vector<8x128xf32> -> vector<8x128xf32>
    %cst_10 = arith.constant dense<0xFF800000> : vector<128xf32>
    %12 = vector.multi_reduction <maximumf>, %11, %cst_10 [0] : vector<8x128xf32> to vector<128xf32>
    %13 = vector.shape_cast %12 : vector<128xf32> to vector<1x128xf32>
    %14 = vector.broadcast %13 : vector<1x128xf32> to vector<8x128xf32>
    %15 = arith.subf %11, %14 : vector<8x128xf32>
    %16 = math.exp %15 : vector<8x128xf32>
    %cst_11 = arith.constant dense<0.000000e+00> : vector<128xf32>
    %17 = vector.multi_reduction <add>, %16, %cst_11 [0] : vector<8x128xf32> to vector<128xf32>
    %18 = vector.shape_cast %17 : vector<128xf32> to vector<1x128xf32>
    %19 = tpu.reciprocal %18 {approx = true} : vector<1x128xf32> -> vector<1x128xf32>
    %20 = vector.broadcast %19 : vector<1x128xf32> to vector<8x128xf32>
    %21 = arith.mulf %16, %20 : vector<8x128xf32>
    %22 = arith.truncf %21 : vector<8x128xf32> to vector<8x128xbf16>
    %c0_12 = arith.constant 0 : index
    %c0_13 = arith.constant 0 : index
    %c0_14 = arith.constant 0 : index
    %23 = vector.load %arg10[%c0_12, %c0_13, %c0_14] : memref<1x8x128xbf16, #tpu.memory_space<vmem>>, vector<1x8x128xbf16>
    %24 = vector.shape_cast %23 : vector<1x8x128xbf16> to vector<8x128xbf16>
    %25 = vector.shape_cast %22 : vector<8x128xbf16> to vector<1x8x128xbf16>
    tpu.vector_store %arg10[%c0_12, %c0_13, %c0_14], %25 {strides = array<i32>} : memref<1x8x128xbf16, #tpu.memory_space<vmem>>, vector<1x8x128xbf16>,
    %c0_15 = arith.constant 0 : index
    %c0_16 = arith.constant 0 : index
    %c0_17 = arith.constant 0 : index
    %26 = vector.load %arg4[%c0_15, %c0_16, %c0_17] : memref<1x32x8xbf16, #tpu.memory_space<vmem>>, vector<1x32x8xbf16>
    %27 = vector.shape_cast %26 : vector<1x32x8xbf16> to vector<32x8xbf16>
    %cst_18 = arith.constant dense<0.000000e+00> : vector<32x128xf32>
    %28 = tpu.matmul %27, %22, %cst_18 {dimension_numbers = #tpu.dot_dimension_numbers<[1], [0], [0], [1], [0, 0, 1, 1], [], []>} : vector<32x8xbf16>, vector<8x128xbf16>, vector<32x128xf32> -> vector<32x128xf32>
    %c0_19 = arith.constant 0 : index
    %c0_20 = arith.constant 0 : index
    %29 = vector.load %arg7[%c0_19, %c0_20] : memref<4x32xbf16, #tpu.memory_space<vmem>>, vector<4x32xbf16>
    %30 = arith.truncf %28 : vector<32x128xf32> to vector<32x128xbf16>
    %cst_21 = arith.constant dense<0.000000e+00> : vector<4x128xf32>
    %31 = tpu.matmul %29, %30, %cst_21 {dimension_numbers = #tpu.dot_dimension_numbers<[1], [0], [0], [1], [0, 0, 1, 1], [], []>} : vector<4x32xbf16>, vector<32x128xbf16>, vector<4x128xf32> -> vector<4x128xf32>
    %c0_22 = arith.constant 0 : index
    %c0_23 = arith.constant 0 : index
    %32 = vector.load %arg8[%c0_22, %c0_23] : memref<4x1xf32, #tpu.memory_space<vmem>>, vector<4x1xf32>
    %33 = vector.broadcast %32 : vector<4x1xf32> to vector<4x128xf32>
    %34 = arith.addf %31, %33 : vector<4x128xf32>
    %c0_24 = arith.constant 0 : index
    %c0_25 = arith.constant 0 : index
    %c0_26 = arith.constant 0 : index
    %35 = vector.load %arg9[%c0_24, %c0_25, %c0_26] : memref<1x4x128xf32, #tpu.memory_space<vmem>>, vector<1x4x128xf32>
    %36 = vector.shape_cast %35 : vector<1x4x128xf32> to vector<4x128xf32>
    %37 = vector.shape_cast %34 : vector<4x128xf32> to vector<1x4x128xf32>
    tpu.vector_store %arg9[%c0_24, %c0_25, %c0_26], %37 {strides = array<i32>} : memref<1x4x128xf32, #tpu.memory_space<vmem>>, vector<1x4x128xf32>,
    return
  }
  func.func @transform_0(%arg0: i32, %arg1: i32) -> (i32, i32, i32) {
    %c0_i32 = arith.constant 0 : i32
    %c0_i32_0 = arith.constant 0 : i32
    return %arg0, %c0_i32, %arg1 : i32, i32, i32
  }
  func.func @transform_1(%arg0: i32, %arg1: i32) -> (i32, i32, i32) {
    %c0_i32 = arith.constant 0 : i32
    %c0_i32_0 = arith.constant 0 : i32
    %c0_i32_1 = arith.constant 0 : i32
    return %arg0, %c0_i32, %c0_i32_0 : i32, i32, i32
  }
  func.func @transform_2(%arg0: i32, %arg1: i32) -> (i32, i32, i32) {
    %c0_i32 = arith.constant 0 : i32
    %c0_i32_0 = arith.constant 0 : i32
    %c0_i32_1 = arith.constant 0 : i32
    return %arg0, %c0_i32, %c0_i32_0 : i32, i32, i32
  }
  func.func @transform_3(%arg0: i32, %arg1: i32) -> (i32, i32) {
    %c0_i32 = arith.constant 0 : i32
    %c0_i32_0 = arith.constant 0 : i32
    %c0_i32_1 = arith.constant 0 : i32
    return %c0_i32, %c0_i32_0 : i32, i32
  }
  func.func @transform_4(%arg0: i32, %arg1: i32) -> (i32, i32) {
    %c0_i32 = arith.constant 0 : i32
    %c0_i32_0 = arith.constant 0 : i32
    %c0_i32_1 = arith.constant 0 : i32
    return %c0_i32, %c0_i32_0 : i32, i32
  }
  func.func @transform_5(%arg0: i32, %arg1: i32) -> (i32, i32) {
    %c0_i32 = arith.constant 0 : i32
    %c0_i32_0 = arith.constant 0 : i32
    %c0_i32_1 = arith.constant 0 : i32
    return %c0_i32, %c0_i32_0 : i32, i32
  }
  func.func @transform_6(%arg0: i32, %arg1: i32) -> (i32, i32) {
    %c0_i32 = arith.constant 0 : i32
    %c0_i32_0 = arith.constant 0 : i32
    %c0_i32_1 = arith.constant 0 : i32
    return %c0_i32, %c0_i32_0 : i32, i32
  }
  func.func @transform_7(%arg0: i32, %arg1: i32) -> (i32, i32, i32) {
    %c0_i32 = arith.constant 0 : i32
    %c0_i32_0 = arith.constant 0 : i32
    return %arg0, %c0_i32, %arg1 : i32, i32, i32
  }
  func.func @transform_8(%arg0: i32, %arg1: i32) -> (i32, i32, i32) {
    %c0_i32 = arith.constant 0 : i32
    %c0_i32_0 = arith.constant 0 : i32
    return %arg0, %c0_i32, %arg1 : i32, i32, i32
  }
}

</mosaic_0001>

<bundles_post_ra>
// kernel: tpu_custom_call.1
= control target key start
LH: loop header
LB: loop body
LE: loop exit
PB: predicated region body
PF: predicated region fallthrough
CT: control target
= control target key end

     0   :  { %14 = vsyncpa [#allocation3], 0  ;;  %s1413_s0 = inlined_call_operand.vmem [shape: f32[2,4,256], index: 0, kind: input, shape index: {}]   ;;  %s1414_s1 = inlined_call_operand.vmem [shape: bf16[2,8,32], index: 1, kind: input, shape index: {}]   ;;  %s1415_s2 = inlined_call_operand.vmem [shape: bf16[2,32,8], index: 2, kind: input, shape index: {}]   ;;  %s1416_s3 = inlined_call_operand.vmem [shape: bf16[32,4], index: 3, kind: input, shape index: {}]   ;;  %s1417_s4 = inlined_call_operand.vmem [shape: f32[32,1], index: 4, kind: input, shape index: {}]   ;;  %s1418_s5 = inlined_call_operand.vmem [shape: bf16[4,32], index: 5, kind: input, shape index: {}]   ;;  %s1419_s6 = inlined_call_operand.vmem [shape: f32[4,1], index: 6, kind: input, shape index: {}]   ;;  %s1420_s7 = inlined_call_operand.hbm [shape: f32[2,4,256], index: 7, kind: output, shape index: {0}]   ;;  %s1421_s8 = inlined_call_operand.hbm [shape: bf16[2,8,256], index: 8, kind: output, shape index: {1}]  }
   0x1   :  { %16 = vsyncpa [#allocation3 + $0x1], 0 }
   0x2   :  { %17 = vsyncpa [#allocation5], 0 }
   0x3   :  { %19 = vsyncpa [#allocation5 + $0x1], 0  ;;  %s1185_s27 = smov 0   ;;  %s1187_s28 = smov 0  }
   0x4   :  { %s1189_s29 = smov 0   ;;  %s1191_s30 = smov 0  }
   0x5   :  { %s1193_s9 = smov 0   ;;  %s1195_s10 = smov 0  }
   0x6   :  { %s1197_s11 = smov 0   ;;  %s1199_s12 = smov 0  }
   0x7 LB: > { %1426 = sst [smem:[#allocation8_spill]] %s1125_s10  ;;  %s845_s13 = sadd.s32 4294967295, %s1133_s12   ;;  %s1133_s12 = sphi %s1199_s12, %s25_s12   ;;  %s1129_s11 = sphi %s1197_s11, %s1437_s11   ;;  %s1125_s10 = sphi %s1195_s10, %s1436_s10   ;;  %s1121_s9 = sphi %s1193_s9, %s1435_s9   ;;  %s1117_s30 = sphi %s1191_s30, %s1434_s30   ;;  %s1113_s29 = sphi %s1189_s29, %s1440_s29   ;;  %s1109_s28 = sphi %s1187_s28, %s1439_s28   ;;  %s1105_s27 = sphi %s1185_s27, %s1438_s27  }
   0x8   : > { %1427 = sst [smem:[#allocation9_spill]] %s1129_s11  ;;  %s846_s14 = sadd.s32 4294967294, %s1133_s12  }
   0x9   : > { %s34_s15 = sadd.s32 1, %s1125_s10  ;;  %s37_s16 = sadd.s32 1, %s1129_s11 }
   0xa   : > { %p35_p0 = scmp.ge.s32.totalorder %s34_s15, 2  ;;  %p220_p1 = scmp.ne.s32.totalorder %s1113_s29, %s1109_s28 }
   0xb   : > { %p221_p2 = scmp.eq.s32.totalorder %s845_s13, 3  ;;  %p226_p5 = scmp.ne.s32.totalorder %s1109_s28, %s1105_s27 }
   0xc   : > { %s1442_s15 = smov (%p35_p0, %s34_s15), 0  ;;  %s1444_s16 = smov (!%p35_p0, %s37_s16), %s1129_s11 }
   0xd   : > { %1428 = sst [smem:[#allocation10_spill]] %s1442_s15  ;;  %s206_s17 = ssub.s32 %s1125_s10, %s1442_s15 }
   0xe   : > { %p1236_p3 = por %p221_p2, %p220_p1  ;;  %p39_p4 = scmp.ge.s32.totalorder %s1444_s16, 2 }
   0xf   : > { %p227_p6 = scmp.eq.s32.totalorder %s846_s14, 3  ;;  %p849_p7 = scmp.ge.s32.totalorder %s1133_s12, 1 }
  0x10   : > { %s1446_s16 = smov (%p39_p4, %s1444_s16), 0  ;;  %p311_p9 = scmp.lt.s32.totalorder %s1133_s12, 5 }
  0x11   : > { %1430 = sst [smem:[#allocation11_spill]] %s1446_s16  ;;  %p1245_p8 = por %p227_p6, %p226_p5 }
  0x12   : > { %s205_s20 = ssub.s32 %s1129_s11, %s1446_s16  ;;  %s210_s21 = sadd.s32 1, %s1113_s29 }
  0x13   : > { %s207_s22 = sor.u32 %s206_s17, %s205_s20  ;;  %p312_p10 = pnand %p849_p7, %p311_p9 }
  0x14   : > { %p208_p11 = scmp.eq.s32.totalorder %s207_s22, 0  ;;  %p362_p12 = scmp.lt.s32.totalorder (!%p312_p10), %s1121_s9, 1  ;;  %v999_v0 = vld [vmem:[%s1416_s3] sm:$0xff] (!%p312_p10)   ;;  %vm420_vm0 = vcmask (!%p312_p10), 31744   ;;  %v1135_v2 = vmov (!%p312_p10), 0   ;;  %v388_v3 = vld [vmem:[%s1417_s4 + $0x10] sm:$0xff] (!%p312_p10) }
  0x15   : > { %315 = sbr.rel (%p312_p10) target bundleno = 989 (0x3dd), region = 48  ;;  %p364_p13 = scmp.lt.s32.totalorder (!%p312_p10), %s1117_s30, 1  ;;  %890 = vmatprep.mubr.msk.bf16.mxu0 (!%p312_p10), %vm420_vm0, %v999_v0  ;;  %v386_v1 = vld [vmem:[%s1417_s4] sm:$0xff] (!%p312_p10)  ;;  %997 = vset.pattern.permute.xlu0 (!%p312_p10), %v1135_v2  ;;  %v387_v4 = vld [vmem:[%s1417_s4 + $0x8] sm:$0xff] (!%p312_p10)  ;;  %v389_v5 = vld [vmem:[%s1417_s4 + $0x18] sm:$0xff] (!%p312_p10)  ;;  %vm427_vm1 = vcmask (!%p312_p10), 1041408  }
  0x16   : > { %s1254_s23 = scalar_select %p208_p11, %s1113_s29, %s210_s21  }
  0x17   : > { %998 = vset.pattern.permute.xlu1 (!%p312_p10), %v1135_v2  ;;  %392 = vperm.xlu0 (!%p312_p10), %997, %v386_v1   ;;  %v623_v8 = vld [vmem:[%s1419_s6] sm:$0xf] (!%p312_p10)  ;;  %v1000_v10 = vld [vmem:[%s1416_s3 + $0x8] sm:$0xff] (!%p312_p10)   ;;  %v1136_v11 = vmov (!%p312_p10), 0.0   ;;  %vm1137_vm2 = vmmov (!%p312_p10), 0   ;;  %vm483_vm3 = vcmask (!%p312_p10), 261120  }
  0x18   : > { %1432 = sst [smem:[#allocation12_spill]] %s1254_s23  ;;  %402 = vperm.xlu1 (!%p312_p10), %998, %v388_v3   ;;  %894 = vmatprep.subr.bf16.mxu1 (!%p312_p10), %v1136_v11  ;;  %vm560_vm4 = vcmask (!%p312_p10), 64512   ;;  %vm567_vm5 = vcmask (!%p312_p10), 1043456   ;;  %v620_v58 = vld [vmem:[%s1418_s5] sm:$0x3] (!%p312_p10)  ;;  %s869_s21 = sshll.u32 (!%p312_p10), %s1121_s9, 1 }
  0x19   : > { %898 = vmatprep.mubr.msk.bf16.mxu1 (!%p312_p10), %vm1137_vm2, %v1136_v11 }
  0x1b   : > { %397 = vperm.xlu0 (!%p312_p10), %997, %v387_v4  }
  0x1c   : > { %s1262_s26 = scalar_select %p362_p12, %s1121_s9, 1  ;;  %407 = vperm.xlu1 %998, %v389_v5  }
  0x1d   : > { %s365_s17 = scalar_select %p364_p13, %s1117_s30, 1 }
  0x1e   : > { %s852_s22 = sshll.u32 %s1262_s26, 1  ;;  %s854_s10 = sshll.u32 %s1262_s26, 2 }
  0x1f   : > { %s367_s24 = sadd.s32 %s852_s22, %s365_s17  ;;  %626 = vperm.xlu0 %997, %v623_v8   ;;  %s875_s22 = sshll.u32 %s1262_s26, 4 }
  0x20   : > { %s853_s13 = sshll.u32 %s367_s24, 2  ;;  %s1310_s26 = sand.u32 1, %s1109_s28  }
  0x21   : > { %s369_s23 = scalar_lea.vmem %s1413_s0, %s853_s13  ;;  %s1305_s13 = scalar_lea.vmem %s1415_s2, %s875_s22 }
  0x22   : > { %v380_v6 = vld [vmem:[%s369_s23] sm:$0xf]  ;;  %s373_s23 = scalar_lea.vmem %s1414_s1, %s854_s10  ;;  %s850_s14 = sshll.u32 %s1310_s26, 2  ;;  %v1002_v51 = vld [vmem:[%s1305_s13 + $0x8] sm:$0xff]  }
  0x23   : > { %v381_v7 = vpack.c.bf16 %v380_v6, %v380_v6  ;;  %v482_v26 = vld [vmem:[%s373_s23] sm:$0xf]  ;;  %s361_s20 = scalar_lea.vmem [#allocation4], %s850_s14  ;;  %s1324_s10 = sadd.s32 %s1117_s30, %s869_s21 }
  0x24   : > { %v1001_v27 = vld [vmem:[%s1305_s13] sm:$0xff]   ;;  %s870_s11 = sshll.u32 %s1324_s10, 6  ;;  %s709_s24 = sshll.u32 %s361_s20, 4  ;;  %s710_s24 = int_to_ptr.vmem [resolvable:$true] %s709_s24 }
  0x25   : > { %916 = vmatprep.subr.msk.bf16.mxu0 %vm427_vm1, %v381_v7  ;;  %v429_v9 = vsel %vm427_vm1, %v381_v7, 0  ;;  %s1332_s22 = scalar_lea.hbm %s1421_s8, %s870_s11  ;;  %s679_s25 = scalar_lea.sflag [#allocation5], %s1310_s26 }
  0x26   : > { %889 = vmatpush3.bf16.msra.mxu0 %v429_v9  ;;  %s1007_s13 = scalar_lea.vmem %s710_s24, 64  ;;  %s1138_s9 = smov [#allocation4]  }
  0x27   : > { %p1008_p0 = scmp.ne.s32.totalorder %s710_s24, %s1007_s13  ;;  %s1011_s30 = sshll.u32 %s1138_s9, 4  ;;  %s1012_s30 = int_to_ptr.vmem [resolvable:$false] %s1011_s30 }
  0x28   : > { %s1013_s17 = scalar_lea.vmem %s1012_s30, 128  ;;  %p1014_p4 = scmp.lt.s32.totalorder %s710_s24, %s1012_s30 }
  0x29   : > { %891 = vmatmul.mubr.msk.bf16.vlgmr.msra.gmra.mrb[0].mxu0 %vm420_vm0, %v1000_v10  ;;  %p1009_p1 = pnand %p1008_p0, %p1236_p3  ;;  %p1015_p5 = scmp.lt.s32.totalorder %s1013_s17, %s1007_s13 }
  0x2a   : > { %904 = vmatprep.mubr.msk.bf16.mxu0 %vm560_vm4, %v1001_v27 }
  0x2b   : > { %p1010_p2 = pneg %p1009_p1  ;;  %p1016_p6 = por %p1015_p5, %p1014_p4 }
  0x2d   : > { %p1017_p7 = pnand %p1016_p6, %p1010_p2 }
  0x96   : > { %v393_v13 = vpop.permute.xlu0 %392 }
  0x97   : > { %v403_v12 = vpop.permute.xlu1 %402 }
  0x9a   : > { %v398_v18 = vpop.permute.xlu0 %397 }
  0x9b   : > { %v408_v15 = vpop.permute.xlu1 %407 }
  0xfc   : > { %v892_v14 = vpop.f32.mrb[0].mxu0 }
  0xfd   : > { %v465_v16 = vpop.f32.mrb[1].mxu0  ;;  %v474_v19 = vadd.f32 %v892_v14, %v403_v12 }
  0xfe   : > { %v893_v17 = vpop.f32.mrb[2].mxu0  ;;  %v466_v22 = vadd.f32 %v465_v16, %v393_v13 }
  0xff   : > { %v477_v20 = vadd.f32 %v893_v17, %v408_v15  ;;  %v468_v21 = vpop.f32.mrb[3].mxu0 }
 0x100   : > { %v469_v23 = vadd.f32 %v468_v21, %v398_v18 }
 0x101   : > { %v481_v24 = vpack.c.bf16 %v477_v20, %v474_v19 }
 0x102   : > { %v480_v25 = vpack.c.bf16 %v469_v23, %v466_v22 }
 0x104   : > { %895 = vmatpush3.bf16.msra.mxu1 %v480_v25 }
 0x105   : > { %896 = vmatprep.subr.bf16.mxu1 %v1136_v11 }
 0x108   : > { %897 = vmatpush3.bf16.msra.mxu1 %v481_v24 }
 0x109   : > { %908 = vmatprep.subr.bf16.mxu1 %v1136_v11 }
 0x10b   : > { %899 = vmatmul.mubr.msk.bf16.vlgmr.msra.gmra.mrb[0].mxu1 %vm483_vm3, %v482_v26 }
 0x10c   : > { %912 = vmatprep.mubr.msk.bf16.mxu1 %vm1137_vm2, %v1136_v11 }
 0x1de   : > { %v521_v28 = vpop.f32.mrb[0].mxu1 }
 0x1df   : > { %v527_v29 = vrot.slane %v521_v28, 4  ;;  %v900_v30 = vpop.f32.mrb[1].mxu1 }
 0x1e0   : > { %v524_v31 = vpop.f32.mrb[2].mxu1 }
 0x1e1   : > { %v528_v32 = vmax.f32 %v521_v28, %v527_v29  ;;  %v901_v33 = vpop.f32.mrb[3].mxu1 }
 0x1e3   : > { %v529_v34 = vrot.slane %v528_v32, 2 }
 0x1e5   : > { %v530_v35 = vmax.f32 %v528_v32, %v529_v34 }
 0x1e7   : > { %v531_v36 = vrot.slane %v530_v35, 1 }
 0x1e9   : > { %v532_v37 = vmax.f32 %v530_v35, %v531_v36 }
 0x1eb   : > { %v533_v38 = vsub.f32 %v521_v28, %v532_v37 }
 0x1ed   : > { %v534_v39 = vmul.f32 1.442695, %v533_v38 }
 0x1ef   : > { %1003 = vpow2.f32 %v534_v39 }
 0x1f9   : > { %v1004_v40 = vpop.eup %1003 }
 0x1fa   : > { %v536_v41 = vrot.slane %v1004_v40, 4 }
 0x1fc   : > { %v537_v42 = vadd.f32 %v1004_v40, %v536_v41 }
 0x1fe   : > { %v538_v43 = vrot.slane %v537_v42, 2 }
 0x200   : > { %v539_v44 = vadd.f32 %v538_v43, %v537_v42 }
 0x202   : > { %v540_v45 = vrot.slane %v539_v44, 1 }
 0x204   : > { %v541_v46 = vadd.f32 %v540_v45, %v539_v44 }
 0x206   : > { %1005 = vrcp.f32 %v541_v46 }
 0x210   : > { %v1006_v47 = vpop.eup %1005 }
 0x211   : > { %v543_v48 = vmul.f32 %v1006_v47, %v1004_v40 }
 0x213   : > { %v544_v49 = vpack.c.bf16 %v543_v48, %v543_v48 }
 0x215   : > { %917 = vmatprep.subr.msk.bf16.mxu0 %vm567_vm5, %v544_v49  ;;  %v569_v50 = vsel %vm567_vm5, %v544_v49, 0  ;;  %545 = vst [vmem:[%s361_s20] sm:$0xf] %v544_v49 }
 0x216   : > { %903 = vmatpush3.bf16.msra.mxu0 %v569_v50 }
 0x219   : > { %905 = vmatmul.mubr.msk.bf16.vlgmr.msra.gmra.mrb[4].mxu0 %vm560_vm4, %v1002_v51 }
 0x2ec   : > { %v906_v52 = vpop.f32.mrb[4].mxu0 }
 0x2ed   : > { %v605_v53 = vpop.f32.mrb[5].mxu0 }
 0x2ee   : > { %v907_v54 = vpop.f32.mrb[6].mxu0 }
 0x2ef   : > { %v622_v55 = vpack.c.bf16 %v907_v54, %v906_v52  ;;  %v608_v56 = vpop.f32.mrb[7].mxu0 }
 0x2f0   : > { %v621_v57 = vpack.c.bf16 %v608_v56, %v605_v53 }
 0x2f2   : > { %909 = vmatpush3.bf16.msra.mxu1 %v621_v57 }
 0x2f3   : > { %910 = vmatprep.subr.bf16.mxu1 %v1136_v11 }
 0x2f6   : > { %911 = vmatpush3.bf16.msra.mxu1 %v622_v55 }
 0x2f9   : > { %913 = vmatmul.mubr.msk.bf16.vlgmr.msra.gmra.mrb[4].mxu1 %vm483_vm3, %v620_v58 }
 0x2fa   : > { %1020 = shalt.err (!%p1017_p7)
}
 0x2fb   : > { %s1021_s20 = scalar_lea.hbm %s1332_s22, 64  ;;  %s1025_s15 = scalar_lea.hbm %s1421_s8, 256 }
 0x2fc   : > { %p1022_p9 = scmp.ne.s32.totalorder %s1332_s22, %s1021_s20  ;;  %p1026_p12 = scmp.lt.u32.totalorder %s1332_s22, %s1421_s8 }
 0x2fd   : > { %p1027_p13 = scmp.lt.u32.totalorder %s1025_s15, %s1021_s20  ;;  %p1029_p1 = scmp.lt.u32.totalorder %s1021_s20, %s1332_s22 }
 0x2fe   : > { %p1023_p10 = pnand %p1022_p9, %p1236_p3 }
 0x2ff   : > { %p1028_p0 = por %p1027_p13, %p1026_p12 }
 0x300   : > { %p1024_p11 = pneg %p1023_p10 }
 0x301   : > { %p1030_p2 = por %p1029_p1, %p1028_p0 }
 0x303   : > { %p1031_p4 = pnand %p1030_p2, %p1024_p11 }
 0x305   : > { %1034 = shalt.err (!%p1031_p4)
}
 0x306   : > { %919 = dma.vmem_to_hbm [thread:$0]  (%p1236_p3), %s710_s24, 64, %s1332_s22, %s679_s25   ;;  %v627_v59 = vpop.permute.xlu0 %626 }
 0x307   : > { %s354_s13 = scalar_lea.vmem [#allocation2], %s850_s14  ;;  %s1359_s16 = scalar_lea.hbm %s1420_s7, %s870_s11 }
 0x308   : > { %s694_s30 = sshll.u32 %s354_s13, 4  ;;  %s674_s14 = scalar_lea.sflag [#allocation3], %s1310_s26  ;;  %s1361_s30 = int_to_ptr.vmem [resolvable:$true] %s694_s30 }
 0x309   : > { %s1035_s22 = scalar_lea.vmem %s1361_s30, 64  ;;  %s1139_s10 = smov [#allocation2]  }
 0x30a   : > { %p1036_p5 = scmp.ne.s32.totalorder %s1361_s30, %s1035_s22  ;;  %s1039_s24 = sshll.u32 %s1139_s10, 4  ;;  %s1040_s24 = int_to_ptr.vmem [resolvable:$false] %s1039_s24 }
 0x30b   : > { %s1041_s25 = scalar_lea.vmem %s1040_s24, 128  ;;  %p1042_p9 = scmp.lt.s32.totalorder %s1361_s30, %s1040_s24 }
 0x30c   : > { %p1037_p6 = pnand %p1036_p5, %p1236_p3  ;;  %p1043_p10 = scmp.lt.s32.totalorder %s1041_s25, %s1035_s22 }
 0x30e   : > { %p1038_p7 = pneg %p1037_p6  ;;  %p1044_p11 = por %p1043_p10, %p1042_p9 }
 0x310   : > { %p1045_p12 = pnand %p1044_p11, %p1038_p7 }
 0x3cc   : > { %v666_v60 = vpop.f32.mrb[4].mxu1 }
 0x3cd   : > { %v667_v61 = vadd.f32 %v666_v60, %v627_v59  ;;  %v914_v62 = vpop.f32.mrb[5].mxu1 }
 0x3ce   : > { %v669_v63 = vpop.f32.mrb[6].mxu1 }
 0x3cf   : > { %672 = vst [vmem:[%s354_s13] sm:$0xf] %v667_v61  ;;  %v915_v0 = vpop.f32.mrb[7].mxu1 }
 0x3d0   : > { %1048 = shalt.err (!%p1045_p12)
}
 0x3d1   : > { %s1049_s26 = scalar_lea.hbm %s1359_s16, 64  ;;  %s1053_s15 = scalar_lea.hbm %s1420_s7, 256 }
 0x3d2   : > { %p1050_p13 = scmp.ne.s32.totalorder %s1359_s16, %s1049_s26  ;;  %p1054_p2 = scmp.lt.u32.totalorder %s1359_s16, %s1420_s7 }
 0x3d3   : > { %p1055_p4 = scmp.lt.u32.totalorder %s1053_s15, %s1049_s26  ;;  %p1057_p6 = scmp.lt.u32.totalorder %s1049_s26, %s1359_s16 }
 0x3d4   : > { %p1051_p0 = pnand %p1050_p13, %p1236_p3 }
 0x3d5   : > { %p1056_p5 = por %p1055_p4, %p1054_p2 }
 0x3d6   : > { %p1052_p1 = pneg %p1051_p0 }
 0x3d7   : > { %p1058_p7 = por %p1057_p6, %p1056_p5 }
 0x3d9   : > { %p1059_p9 = pnand %p1058_p7, %p1052_p1 }
 0x3db   : > { %1062 = shalt.err (!%p1059_p9)
}
 0x3dc   : > { %918 = dma.vmem_to_hbm [thread:$0]  (%p1236_p3), %s1361_s30, 64, %s1359_s16, %s674_s14  }
 0x3dd PF: > { %p929_p10 = scmp.ge.s32.totalorder %s1133_s12, 2  ;;  %s721_s13 = sand.u32 1, %s1105_s27  }
 0x3de   : > { %s722_s17 = scalar_lea.sflag [#allocation3], %s721_s13 }
 0x3df   : > { %p923_p11 = pnand %p929_p10, %p1245_p8 }
 0x3e1   : > { %1096 = dma.done.wait (!%p923_p11), %s722_s17, 64  }
 0x3e2   : > { %1098 = vsyncadd (!%p923_p11), %s722_s17, 4294967232  ;;  %s731_s20 = scalar_lea.sflag [#allocation5], %s721_s13 }
 0x3e3   : > { %1100 = dma.done.wait (!%p923_p11), %s731_s20, 64  }
 0x3e4   : > { %1102 = vsyncadd (!%p923_p11), %s731_s20, 4294967232  ;;  %s25_s12 = sadd.s32 1, %s1133_s12   ;;  %s1433_s18 = sld [smem:[#allocation12_spill]] }
 0x3e5   : > { %p22_p12 = scmp.ge.s32.totalorder %s25_s12, 6   ;;  %s1434_s30 = sld [smem:[#allocation8_spill]] }
 0x3e6   : > { %s1435_s9 = sld [smem:[#allocation9_spill]]  ;;  %s1436_s10 = sld [smem:[#allocation10_spill]] }
 0x3e7   : > { %s1437_s11 = sld [smem:[#allocation11_spill]]  ;;  %s1438_s27 = smov %s1109_s28 }
 0x3e8   : > { %s1439_s28 = smov %s1113_s29  ;;  %24 = sbr.rel (!%p22_p12) target bundleno = 7 (0x7), region = 106 }
 0x3ea   : > { %s1440_s29 = smov %s1433_s18 }
 0x3ef   :  { %736 = vsyncpa [#allocation3], 1 }
 0x3f0   :  { %738 = vsyncpa [#allocation3 + $0x1], 1 }
 0x3f1   :  { %739 = vsyncpa [#allocation5], 1 }
 0x3f2   :  { %741 = vsyncpa [#allocation5 + $0x1], 1 }

</bundles_post_ra>
